<compile_context>
chip_gen: v7x
topology: tpu7x:2x2x1
jax: 0.10.0
libtpu: 0.0.40
codegen_flags: <defaults>
</compile_context>

<pallas_src>
import math

import jax
import jax.numpy as jnp
from jax.experimental import pallas as pl
from jax.experimental.pallas import tpu as pltpu

_LANES = 128
_SUBLANES = 8
_COLS = 1024                           # lane-dense slab width (8 vregs per row)
_TARGET_TILE_BYTES = 8 * 1024 * 1024   # ~8 MiB per pipelined input tile
_VMEM_LIMIT_BYTES = 48 * 1024 * 1024   # 2x(in+out) buffers + headroom, OK on all gens


def _normalize_kernel(stats_ref, x_ref, o_ref):
    # stats_ref: SMEM (2,) float32 = [mean, 1/std]
    # x_ref, o_ref: VMEM (tile_rows, 1024) lane-dense tiles
    dt = x_ref.dtype
    if jnp.issubdtype(dt, jnp.floating) and jnp.dtype(dt).itemsize < 4:
        # bf16 / fp16: keep math packed (sub-32-bit VALU on v6e/v7x).
        mean = stats_ref[0].astype(dt)
        inv_std = stats_ref[1].astype(dt)
    else:
        mean = stats_ref[0]
        inv_std = stats_ref[1]
    o_ref[...] = ((x_ref[...] - mean) * inv_std).astype(o_ref.dtype)


def normalize_one_mean_std(x, mean, std):
    """Pallas implementation of NormalizeOneMeanStd.forward: (x - mean) / std."""
    # .item() semantics: host scalars (forces a sync if mean/std are device arrays).
    mean = float(mean)
    std = float(std)
    stats = jnp.array([mean, 1.0 / std], dtype=jnp.float32)

    orig_shape = x.shape
    out_dtype = x.dtype if jnp.issubdtype(x.dtype, jnp.floating) else jnp.float32
    total = int(math.prod(orig_shape)) if orig_shape else 1

    # Flatten and pad to a multiple of the slab width so every store is an
    # unmasked full-lane vst; the pad tail is sliced off after the kernel.
    flat = x.reshape(-1)
    padded_total = ((total + _COLS - 1) // _COLS) * _COLS
    if padded_total != total:
        flat = jnp.pad(flat, (0, padded_total - total))

    rows = padded_total // _COLS
    x2 = flat.reshape(rows, _COLS)

    itemsize = jnp.dtype(x.dtype).itemsize
    bytes_per_row = _COLS * itemsize
    max_rows = max(
        _SUBLANES,
        (_TARGET_TILE_BYTES // bytes_per_row) // _SUBLANES * _SUBLANES,
    )

    if rows <= max_rows:
        tile_rows = rows      # block == full extent along rows: always legal
    else:
        tile_rows = max_rows  # multiple of 8; ragged last block is masked by Pallas

    grid = (pl.cdiv(rows, tile_rows),)

    cost = pl.CostEstimate(
        flops=2 * padded_total,
        transcendentals=0,
        bytes_accessed=padded_total * (itemsize + jnp.dtype(out_dtype).itemsize),
    )

    out2 = pl.pallas_call(
        _normalize_kernel,
        out_shape=jax.ShapeDtypeStruct((rows, _COLS), out_dtype),
        grid_spec=pl.GridSpec(
            grid=grid,
            in_specs=[
                pl.BlockSpec(memory_space=pltpu.MemorySpace.SMEM),  # [mean, 1/std]
                pl.BlockSpec((tile_rows, _COLS), lambda i: (i, 0)),
            ],
            out_specs=pl.BlockSpec((tile_rows, _COLS), lambda i: (i, 0)),
        ),
        compiler_params=pltpu.CompilerParams(
            dimension_semantics=("parallel",),
            vmem_limit_bytes=_VMEM_LIMIT_BYTES,
        ),
        cost_estimate=cost,
    )(stats, x2)

    out_flat = out2.reshape(-1)
    if padded_total != total:
        out_flat = out_flat[:total]
    return out_flat.reshape(orig_shape)


if __name__ == "__main__":
    key = jax.random.PRNGKey(0)

    # Primary case: image-style input consistent with the module.
    x = jax.random.normal(key, (2, 4, 16, 16), dtype=jnp.float32)
    mean, std = 0.5, 2.0
    y = jax.block_until_ready(normalize_one_mean_std(x, mean, std))
    ref = (x - mean) / std
    assert y.shape == x.shape
    assert y.dtype == x.dtype
    assert jnp.allclose(y, ref, rtol=1e-6, atol=1e-6), "normalize mismatch (aligned path)"

    # Odd-size case (total not a multiple of 128) -> padded lane-dense path.
    x_odd = jax.random.normal(jax.random.PRNGKey(1), (2, 3, 5, 7), dtype=jnp.float32)
    y_odd = jax.block_until_ready(normalize_one_mean_std(x_odd, -1.25, 0.75))
    ref_odd = (x_odd - (-1.25)) / 0.75
    assert y_odd.shape == x_odd.shape
    assert jnp.allclose(y_odd, ref_odd, rtol=1e-6, atol=1e-6), "normalize mismatch (padded path)"

    # bf16 case: math stays packed in bf16.
    x_bf = jax.random.normal(jax.random.PRNGKey(2), (2, 4, 16, 16), dtype=jnp.bfloat16)
    y_bf = jax.block_until_ready(normalize_one_mean_std(x_bf, 0.25, 1.5))
    ref_bf = ((x_bf - jnp.bfloat16(0.25)) * jnp.bfloat16(1.0 / 1.5))
    assert y_bf.dtype == jnp.bfloat16
    assert jnp.allclose(y_bf.astype(jnp.float32), ref_bf.astype(jnp.float32),
                        rtol=2e-2, atol=2e-2), "normalize mismatch (bf16 path)"

    print("KERNEL_OK")
</pallas_src>

<mosaic_0001>
module attributes {stable_mosaic.version = 11 : i64} {
  func.func @_normalize_kernel(%arg0: i32, %arg1: memref<2xf32, #tpu.memory_space<smem>>, %arg2: memref<2x1024xf32, #tpu.memory_space<vmem>>, %arg3: memref<2x1024xf32, #tpu.memory_space<vmem>>) attributes {dimension_semantics = [#tpu.dimension_semantics<parallel>], iteration_bounds = array<i64: 1>, scalar_prefetch = 0 : i64, scratch_operands = 0 : i64, tpu.core_type = #tpu.core_type<tc>, window_params = [{transform_indices = @transform_0, window_bounds = array<i64: 2>}, {transform_indices = @transform_1, window_bounds = array<i64: 2, 1024>}, {transform_indices = @transform_2, window_bounds = array<i64: 2, 1024>}]} {
    %c0 = arith.constant 0 : index
    %0 = memref.load %arg1[%c0] : memref<2xf32, #tpu.memory_space<smem>>
    %c1 = arith.constant 1 : index
    %1 = memref.load %arg1[%c1] : memref<2xf32, #tpu.memory_space<smem>>
    %c0_0 = arith.constant 0 : index
    %c0_1 = arith.constant 0 : index
    %2 = vector.load %arg2[%c0_0, %c0_1] : memref<2x1024xf32, #tpu.memory_space<vmem>>, vector<2x1024xf32>
    %3 = vector.broadcast %0 : f32 to vector<2x1024xf32>
    %4 = arith.subf %2, %3 : vector<2x1024xf32>
    %5 = vector.broadcast %1 : f32 to vector<2x1024xf32>
    %6 = arith.mulf %4, %5 : vector<2x1024xf32>
    %c0_2 = arith.constant 0 : index
    %c0_3 = arith.constant 0 : index
    %7 = vector.load %arg3[%c0_2, %c0_3] : memref<2x1024xf32, #tpu.memory_space<vmem>>, vector<2x1024xf32>
    tpu.vector_store %arg3[%c0_2, %c0_3], %6 {strides = array<i32>} : memref<2x1024xf32, #tpu.memory_space<vmem>>, vector<2x1024xf32>,
    return
  }
  func.func @transform_0(%arg0: i32) -> i32 {
    %c0_i32 = arith.constant 0 : i32
    %c0_i32_0 = arith.constant 0 : i32
    return %c0_i32 : i32
  }
  func.func @transform_1(%arg0: i32) -> (i32, i32) {
    %c0_i32 = arith.constant 0 : i32
    %c0_i32_0 = arith.constant 0 : i32
    return %arg0, %c0_i32 : i32, i32
  }
  func.func @transform_2(%arg0: i32) -> (i32, i32) {
    %c0_i32 = arith.constant 0 : i32
    %c0_i32_0 = arith.constant 0 : i32
    return %arg0, %c0_i32 : i32, i32
  }
}

</mosaic_0001>

<bundles_post_ra>
// kernel: tpu_custom_call.1
= control target key start
LH: loop header
LB: loop body
LE: loop exit
PB: predicated region body
PF: predicated region fallthrough
CT: control target
= control target key end

     0   :  { %7 = vsyncpa [#allocation5], 0  ;;  %s181_s0 = inlined_call_operand.hbm [shape: f32[2], index: 0, kind: input, shape index: {}]   ;;  %s182_s1 = inlined_call_operand.hbm [shape: f32[2,1024], index: 1, kind: input, shape index: {}]   ;;  %s183_s2 = inlined_call_operand.hbm [shape: f32[2,1024], index: 2, kind: output, shape index: {}]  }
   0x1   :  { %8 = vsyncpa [#allocation3], 0 }
   0x2   :  { %9 = vsyncpa [#allocation4], 0  ;;  %s67_s11 = scalar_lea.hbm %s181_s0, 16 }
   0x3   :  { %p68_p0 = scmp.ne.s32.totalorder %s181_s0, %s67_s11  ;;  %p71_p1 = scmp.lt.u32.totalorder %s67_s11, %s181_s0 }
   0x5   :  { %p73_p2 = pnand %p71_p1, %p68_p0 }
   0x7   :  { %76 = shalt.err (!%p73_p2)
}
   0x8   :  { %s127_s16 = smov [#allocation2]   ;;  %s128_s19 = smov [#allocation6]  }
   0x9   :  { %17 = dma.hbm_to_smem %s181_s0, 16, %s127_s16, [#allocation5]  }
   0xa   :  { %s24_s20 = sshll.u32 %s128_s19, 4  ;;  %s77_s23 = scalar_lea.hbm %s182_s1, 256  ;;  %s25_s20 = int_to_ptr.vmem [resolvable:$true] %s24_s20 }
   0xb   :  { %p78_p3 = scmp.ne.s32.totalorder %s182_s1, %s77_s23  ;;  %p81_p4 = scmp.lt.u32.totalorder %s77_s23, %s182_s1 }
   0xd   :  { %p83_p5 = pnand %p81_p4, %p78_p3 }
   0xf   :  { %86 = shalt.err (!%p83_p5)
}
  0x10   :  { %s87_s28 = scalar_lea.vmem %s25_s20, 256  ;;  %p92_p7 = scmp.lt.s32.totalorder %s25_s20, %s25_s20 }
  0x11   :  { %p88_p6 = scmp.ne.s32.totalorder %s25_s20, %s87_s28  ;;  %p93_p8 = scmp.lt.s32.totalorder %s87_s28, %s87_s28 }
  0x13   :  { %p94_p9 = por %p93_p8, %p92_p7 }
  0x15   :  { %p95_p10 = pnand %p94_p9, %p88_p6 }
  0x17   :  { %98 = shalt.err (!%p95_p10)
}
  0x18   :  { %27 = dma.hbm_to_vmem [thread:$0]  %s182_s1, 256, %s25_s20, [#allocation3]  }
  0x19   :  { %121 = dma.done.wait [#allocation5], 16  }
  0x1a   :  { %122 = vsyncadd [#allocation5], 4294967280 }
  0x1b   :  { %123 = dma.done.wait [#allocation3], 256  }
  0x1c   :  { %124 = vsyncadd [#allocation3], 4294967040 }
  0x1d   :  { %34 = sfence }
  0x1e   :  { %s35_s30 = sld [smem:[#allocation2]]  ;;  %s63_s3 = sld [smem:[#allocation2 + $0x1]]  ;;  %v37_v0 = vld [vmem:[#allocation6] sm:$0xff]  ;;  %v38_v1 = vld [vmem:[#allocation6 + $0x8] sm:$0xff] }
  0x1f   :  { %s129_s4 = smov [#allocation7]  }
  0x20   :  { %s53_s5 = sshll.u32 %s129_s4, 4  ;;  %s54_s5 = int_to_ptr.vmem [resolvable:$true] %s53_s5 }
  0x21   :  { %s99_s1 = scalar_lea.vmem %s54_s5, 256  ;;  %p104_p12 = scmp.lt.s32.totalorder %s54_s5, %s54_s5 }
  0x22   :  { %p100_p11 = scmp.ne.s32.totalorder %s54_s5, %s99_s1  ;;  %p105_p13 = scmp.lt.s32.totalorder %s99_s1, %s99_s1 }
  0x24   :  { %v39_v2 = vstv %s35_s30  ;;  %v42_v3 = vstv %s63_s3  ;;  %p106_p0 = por %p105_p13, %p104_p12 }
  0x25   :  { %v40_v4 = vsub.f32 %v37_v0, %v39_v2  ;;  %v41_v5 = vsub.f32 %v38_v1, %v39_v2 }
  0x26   :  { %p107_p1 = pnand %p106_p0, %p100_p11 }
  0x27   :  { %v43_v6 = vmul.f32 %v42_v3, %v40_v4  ;;  %v44_v7 = vmul.f32 %v42_v3, %v41_v5 }
  0x29   :  { %45 = vst [vmem:[#allocation7] sm:$0xff] %v43_v6  ;;  %46 = vst [vmem:[#allocation7 + $0x8] sm:$0xff] %v44_v7 }
  0x2a   :  { %110 = shalt.err (!%p107_p1)
}
  0x2b   :  { %s111_s8 = scalar_lea.hbm %s183_s2, 256 }
  0x2c   :  { %p112_p2 = scmp.ne.s32.totalorder %s183_s2, %s111_s8  ;;  %p115_p3 = scmp.lt.u32.totalorder %s111_s8, %s183_s2 }
  0x2e   :  { %p117_p4 = pnand %p115_p3, %p112_p2 }
  0x30   :  { %120 = shalt.err (!%p117_p4)
}
  0x31   :  { %56 = dma.vmem_to_hbm [thread:$0]  %s54_s5, 256, %s183_s2, [#allocation4]  }
  0x32   :  { %125 = dma.done.wait [#allocation4], 256  }
  0x33   :  { %126 = vsyncadd [#allocation4], 4294967040 }
  0x34   :  { %60 = vsyncpa [#allocation3], 1 }
  0x35   :  { %61 = vsyncpa [#allocation4], 1 }
  0x36   :  { %62 = vsyncpa [#allocation5], 1 }

</bundles_post_ra>
